<compile_context>
chip_gen: v5e
topology: v5e:2x2
jax: 0.10.0
libtpu: 0.0.40
codegen_flags: <defaults>
</compile_context>

<pallas_src>
import functools
import math

import jax
import jax.numpy as jnp
from jax.experimental import pallas as pl
from jax.experimental.pallas import tpu as pltpu

LN_EPS = 1e-5
LANE = 128


def _round_up(x, m):
    return (x + m - 1) // m * m


def _patch_embed_kernel(x_ref, w_ref, b_ref, g_ref, beta_ref, o_ref, *, inv_e):
    # x_ref: (tm, Cin) bf16 token rows; w_ref: (Cin, Epad) bf16
    # b_ref/g_ref/beta_ref: (1, Epad) f32; o_ref: (tm, Epad) f32
    # Projection on the MXU, accumulate in f32.
    y = jnp.dot(x_ref[...], w_ref[...], preferred_element_type=jnp.float32)
    y = y + b_ref[...]                                  # conv bias (padded cols stay 0)

    # Fused LayerNorm: one pass over y gives sum and sum-of-squares.  Padded embed
    # columns are exactly zero (w/b padded with zeros) so they do not perturb the sums;
    # divide by the *real* E via the baked-in inv_e constant.
    s1 = jnp.sum(y, axis=-1, keepdims=True)
    s2 = jnp.sum(y * y, axis=-1, keepdims=True)
    mean = s1 * inv_e
    var = jnp.maximum(s2 * inv_e - mean * mean, 0.0)
    y_hat = (y - mean) * jax.lax.rsqrt(var + LN_EPS)    # rsqrt -> EUP slot

    # Padded gamma/beta columns are zero, so padded output columns are zero (sliced off
    # in the wrapper).  Lane-dense (multiple-of-128) store.
    o_ref[...] = (y_hat * g_ref[...] + beta_ref[...]).astype(o_ref.dtype)


def overlap_patch_embed(x_nchw, w, b, gamma, beta, stride, *, tm=512):
    """x_nchw: (B, Cin, H, W) f32.  w: (Cin, E).  b/gamma/beta: (E,).

    Returns (tokens, Hout, Wout) with tokens shaped (B, Hout*Wout, E), matching
    torch's proj(x).flatten(2).transpose(1, 2) -> LayerNorm.
    """
    B, Cin, H, W = x_nchw.shape
    assert w.shape[0] == Cin
    E = w.shape[1]

    # kernel_size=1 conv with stride == strided spatial subsample (PyTorch output size
    # for k=1, pad=0: floor((L-1)/stride)+1, reproduced by ::stride slicing).
    xs = x_nchw[:, :, ::stride, ::stride]               # (B, Cin, Hout, Wout)
    Hout, Wout = xs.shape[2], xs.shape[3]
    N = B * Hout * Wout

    # Token-major rows (matches flatten(2).transpose(1,2) ordering).  Cast to bf16 first
    # so the relayout moves half the bytes; under jit XLA fuses slice/transpose/cast into
    # one pass.  Note this relayout touches only N*Cin elements, a few % of the kernel's
    # own HBM traffic for small Cin.
    # TODO(synk): fully fuse this gather into the kernel via a pl.ANY NCHW ref + strided
    # DMA to remove the remaining wrapper-side HBM pass.
    x_rows = jnp.transpose(xs.astype(jnp.bfloat16), (0, 2, 3, 1)).reshape(N, Cin)

    # Lane-dense output width: pad embed dim to a multiple of 128.
    Epad = _round_up(E, LANE)
    w_p = jnp.zeros((Cin, Epad), jnp.bfloat16).at[:, :E].set(w.astype(jnp.bfloat16))
    b_p = jnp.zeros((1, Epad), jnp.float32).at[:, :E].set(b.astype(jnp.float32))
    g_p = jnp.zeros((1, Epad), jnp.float32).at[:, :E].set(gamma.astype(jnp.float32))
    beta_p = jnp.zeros((1, Epad), jnp.float32).at[:, :E].set(beta.astype(jnp.float32))

    # Row tile: large enough to amortize per-grid-step overhead and fill the MXU's M
    # dimension; multiple of 16 for bf16 sublane packing.  Shrink for tiny token counts.
    tm_eff = min(tm, _round_up(N, 16))
    grid_m = pl.cdiv(N, tm_eff)

    kernel = functools.partial(_patch_embed_kernel, inv_e=1.0 / E)

    out = pl.pallas_call(
        kernel,
        out_shape=jax.ShapeDtypeStruct((N, Epad), jnp.float32),
        grid_spec=pltpu.PrefetchScalarGridSpec(
            num_scalar_prefetch=0,
            grid=(grid_m,),
            in_specs=[
                pl.BlockSpec((tm_eff, Cin), lambda i: (i, 0)),   # token rows (tiled)
                pl.BlockSpec((Cin, Epad), lambda i: (0, 0)),     # projection weight (resident)
                pl.BlockSpec((1, Epad), lambda i: (0, 0)),       # conv bias
                pl.BlockSpec((1, Epad), lambda i: (0, 0)),       # LN gamma
                pl.BlockSpec((1, Epad), lambda i: (0, 0)),       # LN beta
            ],
            out_specs=pl.BlockSpec((tm_eff, Epad), lambda i: (i, 0)),
        ),
        compiler_params=pltpu.CompilerParams(
            dimension_semantics=("parallel",)),                  # shards tokens over v7x's 2 TCs
    )(x_rows, w_p, b_p, g_p, beta_p)

    # Drop padded embed columns.  (A downstream fused consumer could take the
    # lane-dense (N, Epad) slab directly and skip this slice.)
    out = out[:, :E].reshape(B, Hout * Wout, E)
    return out, Hout, Wout


def _reference(x_nchw, w, b, gamma, beta, stride):
    # Pure-JAX reference with the same bf16 input quantization the kernel uses
    # (f32 matmul accumulation / f32 LN, two-pass variance).
    xs = x_nchw[:, :, ::stride, ::stride]
    B, Cin, Hout, Wout = xs.shape
    rows = jnp.transpose(xs, (0, 2, 3, 1)).reshape(-1, Cin)
    rows = rows.astype(jnp.bfloat16).astype(jnp.float32)
    w32 = w.astype(jnp.bfloat16).astype(jnp.float32)
    y = rows @ w32 + b
    mean = jnp.mean(y, axis=-1, keepdims=True)
    var = jnp.mean((y - mean) ** 2, axis=-1, keepdims=True)
    y = (y - mean) / jnp.sqrt(var + LN_EPS) * gamma + beta
    return y.reshape(B, Hout * Wout, -1), Hout, Wout


if __name__ == "__main__":
    # Small shapes consistent with the module: B=2, in_chans=4, img=16x16, stride=4,
    # embed_dim=32.  (patch_size only affects self.H/self.W metadata.)
    B, Cin, HW, stride, E = 2, 4, 16, 4, 32
    key = jax.random.PRNGKey(0)
    kx, kw = jax.random.split(key)

    x = jax.random.normal(kx, (B, Cin, HW, HW), dtype=jnp.float32)

    # Deterministic parameter init mirroring _init_weights for Conv2d/LayerNorm:
    fan_out = 1 * 1 * E                                  # kernel 1x1, groups=1
    w = jax.random.normal(kw, (Cin, E), dtype=jnp.float32) * math.sqrt(2.0 / fan_out)
    b = jnp.zeros((E,), dtype=jnp.float32)
    gamma = jnp.ones((E,), dtype=jnp.float32)
    beta = jnp.zeros((E,), dtype=jnp.float32)

    tokens, Hout, Wout = overlap_patch_embed(x, w, b, gamma, beta, stride)
    tokens = jax.block_until_ready(tokens)

    ref, Hr, Wr = _reference(x, w, b, gamma, beta, stride)
    assert (Hout, Wout) == (Hr, Wr)
    assert tokens.shape == (B, Hout * Wout, E)
    assert jnp.allclose(tokens, ref, atol=2e-3, rtol=2e-3), float(jnp.max(jnp.abs(tokens - ref)))

    print("KERNEL_OK")
</pallas_src>

<mosaic_0001>
module attributes {stable_mosaic.version = 11 : i64} {
  func.func @_patch_embed_kernel(%arg0: i32, %arg1: memref<32x4xbf16, #tpu.memory_space<vmem>>, %arg2: memref<4x128xbf16, #tpu.memory_space<vmem>>, %arg3: memref<1x128xf32, #tpu.memory_space<vmem>>, %arg4: memref<1x128xf32, #tpu.memory_space<vmem>>, %arg5: memref<1x128xf32, #tpu.memory_space<vmem>>, %arg6: memref<32x128xf32, #tpu.memory_space<vmem>>) attributes {dimension_semantics = [#tpu.dimension_semantics<parallel>], iteration_bounds = array<i64: 1>, scalar_prefetch = 0 : i64, scratch_operands = 0 : i64, tpu.core_type = #tpu.core_type<tc>, window_params = [{transform_indices = @transform_0, window_bounds = array<i64: 32, 4>}, {pipeline_mode = #tpu.pipeline_mode<synchronous>, transform_indices = @transform_1, window_bounds = array<i64: 4, 128>}, {pipeline_mode = #tpu.pipeline_mode<synchronous>, transform_indices = @transform_2, window_bounds = array<i64: 1, 128>}, {pipeline_mode = #tpu.pipeline_mode<synchronous>, transform_indices = @transform_3, window_bounds = array<i64: 1, 128>}, {pipeline_mode = #tpu.pipeline_mode<synchronous>, transform_indices = @transform_4, window_bounds = array<i64: 1, 128>}, {transform_indices = @transform_5, window_bounds = array<i64: 32, 128>}]} {
    %c0 = arith.constant 0 : index
    %c0_0 = arith.constant 0 : index
    %0 = vector.load %arg1[%c0, %c0_0] : memref<32x4xbf16, #tpu.memory_space<vmem>>, vector<32x4xbf16>
    %c0_1 = arith.constant 0 : index
    %c0_2 = arith.constant 0 : index
    %1 = vector.load %arg2[%c0_1, %c0_2] : memref<4x128xbf16, #tpu.memory_space<vmem>>, vector<4x128xbf16>
    %cst = arith.constant dense<0.000000e+00> : vector<32x128xf32>
    %2 = tpu.matmul %0, %1, %cst {dimension_numbers = #tpu.dot_dimension_numbers<[1], [0], [0], [1], [0, 0, 1, 1], [], []>} : vector<32x4xbf16>, vector<4x128xbf16>, vector<32x128xf32> -> vector<32x128xf32>
    %c0_3 = arith.constant 0 : index
    %c0_4 = arith.constant 0 : index
    %3 = vector.load %arg3[%c0_3, %c0_4] : memref<1x128xf32, #tpu.memory_space<vmem>>, vector<1x128xf32>
    %4 = vector.broadcast %3 : vector<1x128xf32> to vector<32x128xf32>
    %5 = arith.addf %2, %4 : vector<32x128xf32>
    %cst_5 = arith.constant dense<0.000000e+00> : vector<32xf32>
    %6 = vector.multi_reduction <add>, %5, %cst_5 [1] : vector<32x128xf32> to vector<32xf32>
    %7 = vector.shape_cast %6 : vector<32xf32> to vector<32x1xf32>
    %8 = arith.mulf %5, %5 : vector<32x128xf32>
    %cst_6 = arith.constant dense<0.000000e+00> : vector<32xf32>
    %9 = vector.multi_reduction <add>, %8, %cst_6 [1] : vector<32x128xf32> to vector<32xf32>
    %10 = vector.shape_cast %9 : vector<32xf32> to vector<32x1xf32>
    %cst_7 = arith.constant 3.125000e-02 : f32
    %11 = vector.broadcast %cst_7 : f32 to vector<32x1xf32>
    %12 = arith.mulf %7, %11 : vector<32x1xf32>
    %cst_8 = arith.constant 3.125000e-02 : f32
    %13 = vector.broadcast %cst_8 : f32 to vector<32x1xf32>
    %14 = arith.mulf %10, %13 : vector<32x1xf32>
    %15 = arith.mulf %12, %12 : vector<32x1xf32>
    %16 = arith.subf %14, %15 : vector<32x1xf32>
    %cst_9 = arith.constant 0.000000e+00 : f32
    %17 = vector.broadcast %cst_9 : f32 to vector<32x1xf32>
    %18 = arith.maximumf %16, %17 : vector<32x1xf32>
    %19 = vector.broadcast %12 : vector<32x1xf32> to vector<32x128xf32>
    %20 = arith.subf %5, %19 : vector<32x128xf32>
    %cst_10 = arith.constant 9.99999974E-6 : f32
    %21 = vector.broadcast %cst_10 : f32 to vector<32x1xf32>
    %22 = arith.addf %18, %21 : vector<32x1xf32>
    %23 = math.rsqrt %22 : vector<32x1xf32>
    %24 = vector.broadcast %23 : vector<32x1xf32> to vector<32x128xf32>
    %25 = arith.mulf %20, %24 : vector<32x128xf32>
    %c0_11 = arith.constant 0 : index
    %c0_12 = arith.constant 0 : index
    %26 = vector.load %arg4[%c0_11, %c0_12] : memref<1x128xf32, #tpu.memory_space<vmem>>, vector<1x128xf32>
    %27 = vector.broadcast %26 : vector<1x128xf32> to vector<32x128xf32>
    %28 = arith.mulf %25, %27 : vector<32x128xf32>
    %c0_13 = arith.constant 0 : index
    %c0_14 = arith.constant 0 : index
    %29 = vector.load %arg5[%c0_13, %c0_14] : memref<1x128xf32, #tpu.memory_space<vmem>>, vector<1x128xf32>
    %30 = vector.broadcast %29 : vector<1x128xf32> to vector<32x128xf32>
    %31 = arith.addf %28, %30 : vector<32x128xf32>
    %c0_15 = arith.constant 0 : index
    %c0_16 = arith.constant 0 : index
    %32 = vector.load %arg6[%c0_15, %c0_16] : memref<32x128xf32, #tpu.memory_space<vmem>>, vector<32x128xf32>
    tpu.vector_store %arg6[%c0_15, %c0_16], %31 {strides = array<i32>} : memref<32x128xf32, #tpu.memory_space<vmem>>, vector<32x128xf32>,
    return
  }
  func.func @transform_0(%arg0: i32) -> (i32, i32) {
    %c0_i32 = arith.constant 0 : i32
    %c0_i32_0 = arith.constant 0 : i32
    return %arg0, %c0_i32 : i32, i32
  }
  func.func @transform_1(%arg0: i32) -> (i32, i32) {
    %c0_i32 = arith.constant 0 : i32
    %c0_i32_0 = arith.constant 0 : i32
    %c0_i32_1 = arith.constant 0 : i32
    return %c0_i32, %c0_i32_0 : i32, i32
  }
  func.func @transform_2(%arg0: i32) -> (i32, i32) {
    %c0_i32 = arith.constant 0 : i32
    %c0_i32_0 = arith.constant 0 : i32
    %c0_i32_1 = arith.constant 0 : i32
    return %c0_i32, %c0_i32_0 : i32, i32
  }
  func.func @transform_3(%arg0: i32) -> (i32, i32) {
    %c0_i32 = arith.constant 0 : i32
    %c0_i32_0 = arith.constant 0 : i32
    %c0_i32_1 = arith.constant 0 : i32
    return %c0_i32, %c0_i32_0 : i32, i32
  }
  func.func @transform_4(%arg0: i32) -> (i32, i32) {
    %c0_i32 = arith.constant 0 : i32
    %c0_i32_0 = arith.constant 0 : i32
    %c0_i32_1 = arith.constant 0 : i32
    return %c0_i32, %c0_i32_0 : i32, i32
  }
  func.func @transform_5(%arg0: i32) -> (i32, i32) {
    %c0_i32 = arith.constant 0 : i32
    %c0_i32_0 = arith.constant 0 : i32
    return %arg0, %c0_i32 : i32, i32
  }
}

</mosaic_0001>

<bundles_post_ra>
// kernel: tpu_custom_call.1
= control target key start
LH: loop header
LB: loop body
LE: loop exit
PB: predicated region body
PF: predicated region fallthrough
CT: control target
= control target key end

     0   :  { %vm48_vm0 = vcmask 1041408   ;;  %vm41_vm1 = vcmask 31744   ;;  %s347_s0 = inlined_call_operand.vmem [shape: bf16[32,4], index: 0, kind: input, shape index: {}]   ;;  %s348_s1 = inlined_call_operand.vmem [shape: bf16[4,128], index: 1, kind: input, shape index: {}]   ;;  %s349_s2 = inlined_call_operand.vmem [shape: f32[1,128], index: 2, kind: input, shape index: {}]   ;;  %s350_s3 = inlined_call_operand.vmem [shape: f32[1,128], index: 3, kind: input, shape index: {}]   ;;  %s351_s4 = inlined_call_operand.vmem [shape: f32[1,128], index: 4, kind: input, shape index: {}]   ;;  %s352_s5 = inlined_call_operand.hbm [shape: f32[32,128], index: 5, kind: output, shape index: {}]  }
   0x1   :  { %v26_v0 = vld [vmem:[%s348_s1] sm:$0x3]  ;;  %v212_v3 = vld [vmem:[%s347_s0 + $0x8] sm:$0xff] }
   0x2   :  { %v50_v1 = vsel %vm48_vm0, %v26_v0, 0  ;;  %v211_v2 = vld [vmem:[%s347_s0] sm:$0xff] }
   0x3   :  { %59 = vmatpush.bf16.msra.mxu0 %v50_v1  ;;  %213 = vmatpush.bf16.msra.mxu1 %v50_v1 }
   0x4   :  { %10 = vsyncpa [#allocation3], 0  ;;  %v217_v4 = vld [vmem:[%s349_s2] ss:$0 sm:$0xff]  ;;  %s189_s29 = sshll.u32 %s352_s5, 4  ;;  %s255_s30 = smov 128   ;;  %s190_s29 = int_to_ptr.hbm [resolvable:$true] %s189_s29 }
   0x5   :  { %v218_v58 = vld [vmem:[%s350_s3] ss:$0 sm:$0xff]  ;;  %s254_s3 = smov [#allocation2]   ;;  %s256_s6 = smov 8  }
   0x6   :  { %209 = vmatmul.msk.bf16.vlgmr.msra.gmra.mxu0 %vm41_vm1, %v211_v2  ;;  %210 = vmatmul.msk.bf16.vlgmr.msra.gmra.mxu1 %vm41_vm1, %v212_v3  ;;  %v219_v61 = vld [vmem:[%s351_s4] ss:$0 sm:$0xff]  ;;  %s187_s4 = sshll.u32 %s254_s3, 4  ;;  %s188_s4 = int_to_ptr.vmem [resolvable:$true] %s187_s4 }
  0x83   :  { %v61_v5 = vpop.f32.mrf.mxu0  ;;  %v66_v6 = vpop.f32.mrf.mxu1 }
  0x84   :  { %v299_v7 = vadd.f32 %v217_v4, %v61_v5  ;;  %v301_v8 = vadd.f32 %v217_v4, %v66_v6 }
  0x86   :  { %75 = vadd.xlane.f32.xlu1 %v301_v8  ;;  %71 = vadd.xlane.f32.xlu0 %v299_v7  ;;  %v79_v9 = vmul.f32 %v299_v7, %v299_v7  ;;  %v81_v16 = vmul.f32 %v301_v8, %v301_v8 }
  0x88   :  { %83 = vadd.xlane.f32.xlu2 %v79_v9 }
  0x8b   :  { %v63_v10 = vpop.f32.mrf.mxu0  ;;  %v68_v11 = vpop.f32.mrf.mxu1 }
  0x8c   :  { %v307_v12 = vadd.f32 %v217_v4, %v63_v10  ;;  %v309_v13 = vadd.f32 %v217_v4, %v68_v11 }
  0x8e   :  { %77 = vadd.xlane.f32.xlu1 %v309_v13  ;;  %73 = vadd.xlane.f32.xlu0 %v307_v12  ;;  %v80_v14 = vmul.f32 %v307_v12, %v307_v12  ;;  %v82_v15 = vmul.f32 %v309_v13, %v309_v13 }
  0x90   :  { %85 = vadd.xlane.f32.xlu2 %v80_v14 }
  0x96   :  { %89 = vadd.xlane.f32.xlu1 %v82_v15  ;;  %87 = vadd.xlane.f32.xlu0 %v81_v16 }
  0xf9   :  { %v76_v17 = vpop.xlane.xlu1 %75  ;;  %v72_v18 = vpop.xlane.xlu0 %71 }
  0xfa   :  { %v91_v19 = vmul.f32 0.03125, %v72_v18  ;;  %v323_v32 = vmul.f32 0.03125, %v76_v17 }
  0xfb   :  { %v84_v20 = vpop.xlane.xlu2 %83 }
  0xfc   :  { %v99_v21 = vmul.f32 %v91_v19, %v91_v19  ;;  %v95_v22 = vmul.f32 0.03125, %v84_v20  ;;  %v101_v38 = vmul.f32 %v323_v32, %v323_v32  ;;  %v111_v57 = vsub.f32 %v299_v7, %v91_v19 }
  0xfe   :  { %v103_v23 = vsub.f32 %v95_v22, %v99_v21 }
 0x100   :  { %v107_v24 = vmax.f32 %v103_v23, 0.0 }
 0x101   :  { %v78_v25 = vpop.xlane.xlu1 %77  ;;  %v74_v26 = vpop.xlane.xlu0 %73 }
 0x102   :  { %v319_v27 = vmul.f32 0.03125, %v74_v26  ;;  %v115_v28 = vadd.f32 1e-05, %v107_v24  ;;  %v325_v33 = vmul.f32 0.03125, %v78_v25 }
 0x103   :  { %v86_v29 = vpop.xlane.xlu2 %85 }
 0x104   :  { %v100_v30 = vmul.f32 %v319_v27, %v319_v27  ;;  %220 = vrsqrt.f32 %v115_v28  ;;  %v96_v31 = vmul.f32 0.03125, %v86_v29  ;;  %v102_v39 = vmul.f32 %v325_v33, %v325_v33 }
 0x105   :  { %vm125_vm3 = vweird.f32 %v115_v28  ;;  %v112_v11 = vsub.f32 %v307_v12, %v319_v27  ;;  %v114_v22 = vsub.f32 %v309_v13, %v325_v33  ;;  %v113_v12 = vsub.f32 %v301_v8, %v323_v32 }
 0x106   :  { %v104_v34 = vsub.f32 %v96_v31, %v100_v30 }
 0x108   :  { %v108_v35 = vmax.f32 %v104_v34, 0.0 }
 0x109   :  { %v90_v36 = vpop.xlane.xlu1 %89  ;;  %v88_v37 = vpop.xlane.xlu0 %87 }
 0x10a   :  { %v98_v40 = vmul.f32 0.03125, %v90_v36  ;;  %v97_v41 = vmul.f32 0.03125, %v88_v37  ;;  %v221_v42 = vpop.eup %220  ;;  %v116_v43 = vadd.f32 1e-05, %v108_v35 }
 0x10b   :  { %v120_v44 = vmul.f32 %v221_v42, %v115_v28  ;;  %vm126_vm2 = vweird.f32 %v221_v42 }
 0x10c   :  { %v106_v45 = vsub.f32 %v98_v40, %v102_v39  ;;  %v105_v46 = vsub.f32 %v97_v41, %v101_v38  ;;  %222 = vrsqrt.f32 %v116_v43  ;;  %vm127_vm4 = vmor %vm125_vm3, %vm126_vm2  ;;  %vm135_vm6 = vweird.f32 %v116_v43 }
 0x10d   :  { %v121_v47 = vmul.f32 %v221_v42, %v120_v44 }
 0x10e   :  { %v110_v48 = vmax.f32 %v106_v45, 0.0  ;;  %v109_v49 = vmax.f32 %v105_v46, 0.0 }
 0x10f   :  { %v122_v50 = vmul.f32 0.5, %v121_v47 }
 0x110   :  { %v118_v51 = vadd.f32 1e-05, %v110_v48  ;;  %v117_v52 = vadd.f32 1e-05, %v109_v49 }
 0x111   :  { %v123_v53 = vsub.f32 1.5, %v122_v50 }
 0x112   :  { %224 = vrsqrt.f32 %v118_v51  ;;  %v223_v54 = vpop.eup %222  ;;  %vm155_vm10 = vweird.f32 %v118_v51  ;;  %vm145_vm12 = vweird.f32 %v117_v52 }
 0x113   :  { %226 = vrsqrt.f32 %v117_v52  ;;  %v124_v55 = vmul.f32 %v221_v42, %v123_v53  ;;  %v130_v56 = vmul.f32 %v223_v54, %v116_v43  ;;  %vm136_vm5 = vweird.f32 %v223_v54 }
 0x114   :  { %vm137_vm7 = vmor %vm135_vm6, %vm136_vm5 }
 0x115   :  { %v128_v59 = vsel %vm127_vm4, %v221_v42, %v124_v55  ;;  %v131_v60 = vmul.f32 %v223_v54, %v130_v56 }
 0x116   :  { %v159_v62 = vmul.f32 %v128_v59, %v111_v57 }
 0x117   :  { %v132_v0 = vmul.f32 0.5, %v131_v60 }
 0x118   :  { %v225_v63 = vpop.eup %224  ;;  %v167_v2 = vmul.f32 %v218_v58, %v159_v62 }
 0x119   :  { %v227_v1 = vpop.eup %226  ;;  %v150_v3 = vmul.f32 %v225_v63, %v118_v51  ;;  %v133_v4 = vsub.f32 1.5, %v132_v0  ;;  %vm156_vm8 = vweird.f32 %v225_v63 }
 0x11a   :  { %v140_v5 = vmul.f32 %v227_v1, %v117_v52  ;;  %v175_v6 = vadd.f32 %v219_v61, %v167_v2  ;;  %vm146_vm9 = vweird.f32 %v227_v1  ;;  %vm157_vm11 = vmor %vm155_vm10, %vm156_vm8 }
 0x11b   :  { %v151_v7 = vmul.f32 %v225_v63, %v150_v3  ;;  %v134_v9 = vmul.f32 %v223_v54, %v133_v4  ;;  %vm147_vm13 = vmor %vm145_vm12, %vm146_vm9 }
 0x11c   :  { %v141_v10 = vmul.f32 %v227_v1, %v140_v5  ;;  %179 = vst [vmem:[#allocation2] sm:$0xff] %v175_v6 }
 0x11d   :  { %v152_v14 = vmul.f32 0.5, %v151_v7  ;;  %v138_v15 = vsel %vm137_vm7, %v223_v54, %v134_v9 }
 0x11e   :  { %v142_v16 = vmul.f32 0.5, %v141_v10  ;;  %v160_v17 = vmul.f32 %v138_v15, %v112_v11 }
 0x11f   :  { %v153_v18 = vsub.f32 1.5, %v152_v14 }
 0x120   :  { %v143_v19 = vsub.f32 1.5, %v142_v16  ;;  %v168_v20 = vmul.f32 %v218_v58, %v160_v17 }
 0x121   :  { %v154_v21 = vmul.f32 %v225_v63, %v153_v18 }
 0x122   :  { %v144_v23 = vmul.f32 %v227_v1, %v143_v19  ;;  %v176_v24 = vadd.f32 %v219_v61, %v168_v20 }
 0x123   :  { %v158_v25 = vsel %vm157_vm11, %v225_v63, %v154_v21 }
 0x124   :  { %v162_v26 = vmul.f32 %v158_v25, %v114_v22  ;;  %v148_v27 = vsel %vm147_vm13, %v227_v1, %v144_v23  ;;  %180 = vst [vmem:[#allocation2 + $0x8] sm:$0xff] %v176_v24 }
 0x125   :  { %v161_v28 = vmul.f32 %v148_v27, %v113_v12 }
 0x126   :  { %v170_v13 = vmul.f32 %v218_v58, %v162_v26 }
 0x127   :  { %v169_v29 = vmul.f32 %v218_v58, %v161_v28 }
 0x128   :  { %v178_v30 = vadd.f32 %v219_v61, %v170_v13 }
 0x129   :  { %v177_v31 = vadd.f32 %v219_v61, %v169_v29 }
 0x12a   :  { %182 = vst [vmem:[#allocation2 + $0x18] sm:$0xff] %v178_v30 }
 0x12b   :  { %181 = vst [vmem:[#allocation2 + $0x10] sm:$0xff] %v177_v31 }
 0x12c   :  { %195 = dma.vmem_to_hbm [thread:$0]  %s188_s4, 512, %s190_s29, [#allocation3], %s255_s30, %s255_s30, %s256_s6  }
 0x12d   :  { %252 = dma.done.wait [#allocation3], 512  }
 0x12e   :  { %253 = vsyncadd [#allocation3], 4294966784 }
 0x12f   :  { %200 = vsyncpa [#allocation3], 1 }

</bundles_post_ra>
